<compile_context>
chip_gen: v7x
topology: tpu7x:2x2x1
jax: 0.10.0
libtpu: 0.0.40
codegen_flags: <defaults>
</compile_context>

<pallas_src>
import functools

import jax
import jax.numpy as jnp
from jax.experimental import pallas as pl
from jax.experimental.pallas import tpu as pltpu


def _ce2d_kernel(x_ref, t_ref, w_ref, out_ref, acc_ref, *,
                 ignore_label, h, w, nth_half):
    """One (batch, H-half, H-tile, W-tile) grid step of weighted 2D CE.

    x_ref:   (C, TH, TW)  logits tile, native dtype; classes on the major axis.
    t_ref:   (TH, TW)     int32 targets tile.
    w_ref:   (C,)         f32 class weights in SMEM.
    out_ref: (2, 1, TW)   per-(batch, half) lane-wise totals [num; den],
                          written once on the last tile of the group.
    acc_ref: (2, TH, TW)  f32 VMEM scratch accumulator, resident across tiles.
    """
    p = pl.program_id(1)
    jh = pl.program_id(2)
    jw = pl.program_id(3)

    first = jnp.logical_and(jh == 0, jw == 0)

    @pl.when(first)
    def _():
        acc_ref[...] = jnp.zeros_like(acc_ref)

    c = x_ref.shape[0]
    th, tw = t_ref.shape
    t = t_ref[...]                                      # (TH, TW) int32

    # Numerically stable log-sum-exp over classes, unrolled over the (small,
    # exact -- no padding) major class axis: pure per-slab VPU/EUP work.
    m = x_ref[0].astype(jnp.float32)
    for k in range(1, c):
        m = jnp.maximum(m, x_ref[k].astype(jnp.float32))

    s = jnp.zeros((th, tw), jnp.float32)
    x_t = jnp.zeros((th, tw), jnp.float32)              # logit of target class
    w_t = jnp.zeros((th, tw), jnp.float32)              # weight of target class
    for k in range(c):
        xk = x_ref[k].astype(jnp.float32)
        s = s + jnp.exp(xk - m)
        hit = t == k
        x_t = x_t + jnp.where(hit, xk, 0.0)
        w_t = w_t + jnp.where(hit, w_ref[k], 0.0)       # scalar from SMEM
    lse = jnp.log(s) + m

    # Validity mask: ignore_label plus ragged H / W tails (tail masks are only
    # generated when a ragged tail exists; they are O(TH + TW) iotas).
    valid = t != ignore_label
    if h % th != 0:
        gh = p * nth_half + jh                          # global H-tile index
        row = gh * th + jax.lax.broadcasted_iota(jnp.int32, (th, 1), 0)
        valid = jnp.logical_and(valid, row < h)
    if w % tw != 0:
        col = jw * tw + jax.lax.broadcasted_iota(jnp.int32, (1, tw), 1)
        valid = jnp.logical_and(valid, col < w)

    # -w[t] * log_softmax(x)[t] == w[t] * (lse - x[t]).  Use `where`, not a
    # multiply-by-mask, so garbage in masked lanes can never leak in.
    acc_ref[0] += jnp.where(valid, w_t * (lse - x_t), 0.0)
    acc_ref[1] += jnp.where(valid, w_t, 0.0)

    last = jnp.logical_and(jh == pl.num_programs(2) - 1,
                           jw == pl.num_programs(3) - 1)

    @pl.when(last)
    def _():
        # Fold the sublane axis once per group; only this tiny (2, 1, TW)
        # block ever goes back to HBM.
        out_ref[0] = jnp.sum(acc_ref[0], axis=0, keepdims=True)
        out_ref[1] = jnp.sum(acc_ref[1], axis=0, keepdims=True)


def _round_up(x, m):
    return -(-x // m) * m


def _vmem_capacity_bytes():
    try:
        cap = getattr(pltpu.get_tpu_info(), "vmem_capacity_bytes", None)
        if cap:
            return int(cap)
    except Exception:
        pass
    return 64 * 1024 * 1024          # conservative default (v7x per-TC)


def _choose_tiles(c, h, w, esize, budget):
    """Pick (th, nth, split, tw, ntw) so one grid step fits the VMEM budget."""
    # Approx. per-pixel VMEM bytes of one step: double-buffered logits +
    # double-buffered int32 targets + (2, TH, TW) f32 accumulator + ~8 f32
    # element-wise temporaries.
    per_px = 2 * c * esize + 48
    max_px = max(budget // per_px, 8 * 128)

    # Width tile: full W when affordable with >= 8 rows, else a multiple of 128.
    if w <= 128 or 8 * w <= max_px:
        tw = w
    else:
        tw = max(128, min(w, max_px // 8) // 128 * 128)
    ntw = -(-w // tw)

    th_cap = max(8, (max_px // tw) // 8 * 8)

    if h < 16:                        # tiny height: one full-height tile
        return h, 1, 1, tw, ntw
    if h <= th_cap:
        # Whole height fits one tile; still cut it in two so both v7x
        # TensorCores get work even when N == 1 (costs ~nothing on 1-TC chips).
        th = min(th_cap, _round_up(-(-h // 2), 8))
        return th, 2, 2, tw, ntw
    th = th_cap
    nth = -(-h // th)
    # Prefer an even H-tile count so the 2-way "parallel" split divides evenly.
    t = th
    while t >= 8 and (-(-h // t)) % 2:
        t -= 8
    if t >= 8:
        return t, -(-h // t), 2, tw, ntw
    return th, nth, 1, tw, ntw


def cross_entropy_loss_2d(inputs, targets, weight=None, size_average=True,
                          ignore_label=-100, vmem_budget_bytes=None):
    """Equivalent of CrossEntropyLoss2D(weight, size_average, ignore_label).

    inputs:  (N, C, H, W) float logits (any float dtype; upcast in-kernel)
    targets: (N, H, W)    integer class labels
    weight:  (C,) per-class weights or None
    """
    inputs = jnp.asarray(inputs)
    n, c, h, w = inputs.shape
    t = jnp.asarray(targets).astype(jnp.int32)

    if weight is None:
        wvec = jnp.ones((c,), jnp.float32)
    else:
        wvec = jnp.asarray(weight, jnp.float32).reshape(c)

    cap = _vmem_capacity_bytes()
    budget = (int(vmem_budget_bytes) if vmem_budget_bytes
              else min(int(cap * 0.4), 48 * 1024 * 1024))
    vmem_limit = max(min(int(cap * 0.8), 96 * 1024 * 1024), 32 * 1024 * 1024)

    esize = inputs.dtype.itemsize
    th, nth, split, tw, ntw = _choose_tiles(c, h, w, esize, budget)
    nth_half = nth // split

    kernel = functools.partial(_ce2d_kernel, ignore_label=int(ignore_label),
                               h=h, w=w, nth_half=nth_half)

    out = pl.pallas_call(
        kernel,
        out_shape=jax.ShapeDtypeStruct((n, split, 2, 1, tw), jnp.float32),
        grid_spec=pltpu.PrefetchScalarGridSpec(
            num_scalar_prefetch=0,
            grid=(n, split, nth_half, ntw),
            in_specs=[
                # 4-D NCHW tiled directly: no reshape / relayout in HBM.
                pl.BlockSpec((None, c, th, tw),
                             lambda i, p, jh, jw: (i, 0, p * nth_half + jh, jw)),
                pl.BlockSpec((None, th, tw),
                             lambda i, p, jh, jw: (i, p * nth_half + jh, jw)),
                # Per-class weights: tiny table, scalar-indexed from SMEM.
                pl.BlockSpec(memory_space=pltpu.MemorySpace.SMEM),
            ],
            out_specs=pl.BlockSpec((None, None, 2, 1, tw),
                                   lambda i, p, jh, jw: (i, p, 0, 0, 0)),
            scratch_shapes=[pltpu.VMEM((2, th, tw), jnp.float32)],
        ),
        compiler_params=pltpu.CompilerParams(
            dimension_semantics=("parallel", "parallel",
                                 "arbitrary", "arbitrary"),
            vmem_limit_bytes=vmem_limit),
    )(inputs, t, wvec)

    totals = jnp.sum(out, axis=(0, 1, 3, 4))      # -> (2,) = [num, den]
    if size_average:
        # PyTorch weighted-mean semantics (NaN if every pixel is ignored).
        return totals[0] / totals[1]
    return totals[0]


def _reference(inputs, targets, weight, size_average, ignore_label):
    """Pure-JAX reference for validation."""
    n, c, h, w = inputs.shape
    x = jnp.transpose(inputs, (0, 2, 3, 1)).reshape(-1, c).astype(jnp.float32)
    t = targets.reshape(-1).astype(jnp.int32)
    logp = jax.nn.log_softmax(x, axis=-1)
    t_safe = jnp.where(t == ignore_label, 0, t)
    logp_t = jnp.take_along_axis(logp, t_safe[:, None], axis=-1)[:, 0]
    w_t = jnp.asarray(weight, jnp.float32)[t_safe]
    valid = (t != ignore_label).astype(jnp.float32)
    num = jnp.sum(-w_t * logp_t * valid)
    den = jnp.sum(w_t * valid)
    return num / den if size_average else num


if __name__ == "__main__":
    key = jax.random.PRNGKey(0)
    ks = jax.random.split(key, 8)

    # --- Test 1: canonical small shape, class weights, ignore label ---------
    N, C, H, W = 2, 4, 16, 16
    x1 = jax.random.normal(ks[0], (N, C, H, W), dtype=jnp.float32)
    t1 = jax.random.randint(ks[1], (N, H, W), 0, C, dtype=jnp.int32)
    w1 = jnp.array([1.0, 1.0, 0.0, 2.0], dtype=jnp.float32)
    ign1 = 2
    got = jax.block_until_ready(cross_entropy_loss_2d(
        x1, t1, weight=w1, size_average=True, ignore_label=ign1))
    ref = _reference(x1, t1, w1, True, ign1)
    assert jnp.allclose(got, ref, rtol=1e-5, atol=1e-5), (got, ref)

    got_sum = jax.block_until_ready(cross_entropy_loss_2d(
        x1, t1, weight=w1, size_average=False, ignore_label=ign1))
    ref_sum = _reference(x1, t1, w1, False, ign1)
    assert jnp.allclose(got_sum, ref_sum, rtol=1e-5, atol=1e-5), (got_sum, ref_sum)

    # --- Test 2: odd shapes, bf16 logits, no class weights, N == 1 ----------
    N, C, H, W = 1, 3, 9, 5
    x2 = jax.random.normal(ks[2], (N, C, H, W), dtype=jnp.float32)
    x2 = x2.astype(jnp.bfloat16)
    t2 = jax.random.randint(ks[3], (N, H, W), 0, C, dtype=jnp.int32)
    t2 = jnp.where(jax.random.uniform(ks[4], (N, H, W)) < 0.2, -100, t2)
    got2 = jax.block_until_ready(cross_entropy_loss_2d(x2, t2))
    ref2 = _reference(x2, t2, jnp.ones((C,), jnp.float32), True, -100)
    assert jnp.allclose(got2, ref2, rtol=1e-4, atol=1e-5), (got2, ref2)

    # --- Test 3: tiny forced VMEM budget -> W tiling + ragged H, split=2 ----
    N, C, H, W = 1, 2, 31, 330
    x3 = jax.random.normal(ks[5], (N, C, H, W), dtype=jnp.float32)
    t3 = jax.random.randint(ks[6], (N, H, W), 0, C, dtype=jnp.int32)
    w3 = jnp.array([0.5, 2.0], dtype=jnp.float32)
    got3 = jax.block_until_ready(cross_entropy_loss_2d(
        x3, t3, weight=w3, size_average=True, ignore_label=0,
        vmem_budget_bytes=120_000))
    ref3 = _reference(x3, t3, w3, True, 0)
    assert jnp.allclose(got3, ref3, rtol=1e-5, atol=1e-5), (got3, ref3)

    # --- Test 4: odd H-tile count -> split fallback, ragged H and W tails ---
    N, C, H, W = 1, 2, 20, 330
    x4 = jax.random.normal(ks[7], (N, C, H, W), dtype=jnp.float32)
    t4 = jax.random.randint(ks[1], (N, H, W), 0, C, dtype=jnp.int32)
    got4 = jax.block_until_ready(cross_entropy_loss_2d(
        x4, t4, weight=w3, size_average=False, ignore_label=0,
        vmem_budget_bytes=120_000))
    ref4 = _reference(x4, t4, w3, False, 0)
    assert jnp.allclose(got4, ref4, rtol=1e-5, atol=1e-5), (got4, ref4)

    print("KERNEL_OK")
</pallas_src>

<mosaic_0001>
module attributes {stable_mosaic.version = 11 : i64} {
  func.func @_ce2d_kernel(%arg0: i32, %arg1: i32, %arg2: i32, %arg3: i32, %arg4: memref<1x4x8x16xf32, #tpu.memory_space<vmem>>, %arg5: memref<1x8x16xi32, #tpu.memory_space<vmem>>, %arg6: memref<4xf32, #tpu.memory_space<smem>>, %arg7: memref<1x1x2x1x16xf32, #tpu.memory_space<vmem>>, %arg8: memref<2x8x16xf32, #tpu.memory_space<vmem>>) attributes {dimension_semantics = [#tpu.dimension_semantics<parallel>, #tpu.dimension_semantics<parallel>, #tpu.dimension_semantics<arbitrary>, #tpu.dimension_semantics<arbitrary>], iteration_bounds = array<i64: 2, 2, 1, 1>, scalar_prefetch = 0 : i64, scratch_operands = 1 : i64, tpu.core_type = #tpu.core_type<tc>, window_params = [{transform_indices = @transform_0, window_bounds = array<i64: 1, 4, 8, 16>}, {transform_indices = @transform_1, window_bounds = array<i64: 1, 8, 16>}, {transform_indices = @transform_2, window_bounds = array<i64: 4>}, {transform_indices = @transform_3, window_bounds = array<i64: 1, 1, 2, 1, 16>}]} {
    %c0_i32 = arith.constant 0 : i32
    %0 = arith.cmpi eq, %arg2, %c0_i32 : i32
    %c0_i32_0 = arith.constant 0 : i32
    %1 = arith.cmpi eq, %arg3, %c0_i32_0 : i32
    %2 = arith.andi %0, %1 : i1
    %3 = arith.extui %2 : i1 to i32
    %c0_i32_1 = arith.constant 0 : i32
    %4 = arith.cmpi ne, %3, %c0_i32_1 : i32
    scf.if %4 {
      %cst_66 = arith.constant 0.000000e+00 : f32
      %108 = vector.broadcast %cst_66 : f32 to vector<2x8x16xf32>
      %c0_67 = arith.constant 0 : index
      %c0_68 = arith.constant 0 : index
      %c0_69 = arith.constant 0 : index
      %109 = vector.load %arg8[%c0_67, %c0_68, %c0_69] : memref<2x8x16xf32, #tpu.memory_space<vmem>>, vector<2x8x16xf32>
      tpu.vector_store %arg8[%c0_67, %c0_68, %c0_69], %108 {strides = array<i32>} : memref<2x8x16xf32, #tpu.memory_space<vmem>>, vector<2x8x16xf32>,
    } else {
    }
    %c0 = arith.constant 0 : index
    %c0_2 = arith.constant 0 : index
    %c0_3 = arith.constant 0 : index
    %5 = vector.load %arg5[%c0, %c0_2, %c0_3] : memref<1x8x16xi32, #tpu.memory_space<vmem>>, vector<1x8x16xi32>
    %6 = vector.shape_cast %5 : vector<1x8x16xi32> to vector<8x16xi32>
    %c0_4 = arith.constant 0 : index
    %c0_5 = arith.constant 0 : index
    %c0_6 = arith.constant 0 : index
    %c0_7 = arith.constant 0 : index
    %7 = vector.load %arg4[%c0_4, %c0_5, %c0_6, %c0_7] : memref<1x4x8x16xf32, #tpu.memory_space<vmem>>, vector<1x1x8x16xf32>
    %8 = vector.shape_cast %7 : vector<1x1x8x16xf32> to vector<8x16xf32>
    %c0_8 = arith.constant 0 : index
    %c1 = arith.constant 1 : index
    %c0_9 = arith.constant 0 : index
    %c0_10 = arith.constant 0 : index
    %9 = vector.load %arg4[%c0_8, %c1, %c0_9, %c0_10] : memref<1x4x8x16xf32, #tpu.memory_space<vmem>>, vector<1x1x8x16xf32>
    %10 = vector.shape_cast %9 : vector<1x1x8x16xf32> to vector<8x16xf32>
    %11 = arith.maximumf %8, %10 : vector<8x16xf32>
    %c0_11 = arith.constant 0 : index
    %c2 = arith.constant 2 : index
    %c0_12 = arith.constant 0 : index
    %c0_13 = arith.constant 0 : index
    %12 = vector.load %arg4[%c0_11, %c2, %c0_12, %c0_13] : memref<1x4x8x16xf32, #tpu.memory_space<vmem>>, vector<1x1x8x16xf32>
    %13 = vector.shape_cast %12 : vector<1x1x8x16xf32> to vector<8x16xf32>
    %14 = arith.maximumf %11, %13 : vector<8x16xf32>
    %c0_14 = arith.constant 0 : index
    %c3 = arith.constant 3 : index
    %c0_15 = arith.constant 0 : index
    %c0_16 = arith.constant 0 : index
    %15 = vector.load %arg4[%c0_14, %c3, %c0_15, %c0_16] : memref<1x4x8x16xf32, #tpu.memory_space<vmem>>, vector<1x1x8x16xf32>
    %16 = vector.shape_cast %15 : vector<1x1x8x16xf32> to vector<8x16xf32>
    %17 = arith.maximumf %14, %16 : vector<8x16xf32>
    %cst = arith.constant 0.000000e+00 : f32
    %18 = vector.broadcast %cst : f32 to vector<8x16xf32>
    %cst_17 = arith.constant 0.000000e+00 : f32
    %19 = vector.broadcast %cst_17 : f32 to vector<8x16xf32>
    %cst_18 = arith.constant 0.000000e+00 : f32
    %20 = vector.broadcast %cst_18 : f32 to vector<8x16xf32>
    %c0_19 = arith.constant 0 : index
    %c0_20 = arith.constant 0 : index
    %c0_21 = arith.constant 0 : index
    %c0_22 = arith.constant 0 : index
    %21 = vector.load %arg4[%c0_19, %c0_20, %c0_21, %c0_22] : memref<1x4x8x16xf32, #tpu.memory_space<vmem>>, vector<1x1x8x16xf32>
    %22 = vector.shape_cast %21 : vector<1x1x8x16xf32> to vector<8x16xf32>
    %23 = arith.subf %22, %17 : vector<8x16xf32>
    %24 = math.exp %23 : vector<8x16xf32>
    %25 = arith.addf %18, %24 : vector<8x16xf32>
    %c0_i32_23 = arith.constant 0 : i32
    %26 = vector.broadcast %c0_i32_23 : i32 to vector<8x16xi32>
    %27 = arith.cmpi eq, %6, %26 : vector<8x16xi32>
    %cst_24 = arith.constant 0.000000e+00 : f32
    %28 = vector.broadcast %cst_24 : f32 to vector<8x16xf32>
    %29 = arith.select %27, %22, %28 : vector<8x16xi1>, vector<8x16xf32>
    %30 = arith.addf %19, %29 : vector<8x16xf32>
    %c0_25 = arith.constant 0 : index
    %31 = memref.load %arg6[%c0_25] : memref<4xf32, #tpu.memory_space<smem>>
    %cst_26 = arith.constant 0.000000e+00 : f32
    %32 = vector.broadcast %31 : f32 to vector<8x16xf32>
    %33 = vector.broadcast %cst_26 : f32 to vector<8x16xf32>
    %34 = arith.select %27, %32, %33 : vector<8x16xi1>, vector<8x16xf32>
    %35 = arith.addf %20, %34 : vector<8x16xf32>
    %c0_27 = arith.constant 0 : index
    %c1_28 = arith.constant 1 : index
    %c0_29 = arith.constant 0 : index
    %c0_30 = arith.constant 0 : index
    %36 = vector.load %arg4[%c0_27, %c1_28, %c0_29, %c0_30] : memref<1x4x8x16xf32, #tpu.memory_space<vmem>>, vector<1x1x8x16xf32>
    %37 = vector.shape_cast %36 : vector<1x1x8x16xf32> to vector<8x16xf32>
    %38 = arith.subf %37, %17 : vector<8x16xf32>
    %39 = math.exp %38 : vector<8x16xf32>
    %40 = arith.addf %25, %39 : vector<8x16xf32>
    %c1_i32 = arith.constant 1 : i32
    %41 = vector.broadcast %c1_i32 : i32 to vector<8x16xi32>
    %42 = arith.cmpi eq, %6, %41 : vector<8x16xi32>
    %cst_31 = arith.constant 0.000000e+00 : f32
    %43 = vector.broadcast %cst_31 : f32 to vector<8x16xf32>
    %44 = arith.select %42, %37, %43 : vector<8x16xi1>, vector<8x16xf32>
    %45 = arith.addf %30, %44 : vector<8x16xf32>
    %c1_32 = arith.constant 1 : index
    %46 = memref.load %arg6[%c1_32] : memref<4xf32, #tpu.memory_space<smem>>
    %cst_33 = arith.constant 0.000000e+00 : f32
    %47 = vector.broadcast %46 : f32 to vector<8x16xf32>
    %48 = vector.broadcast %cst_33 : f32 to vector<8x16xf32>
    %49 = arith.select %42, %47, %48 : vector<8x16xi1>, vector<8x16xf32>
    %50 = arith.addf %35, %49 : vector<8x16xf32>
    %c0_34 = arith.constant 0 : index
    %c2_35 = arith.constant 2 : index
    %c0_36 = arith.constant 0 : index
    %c0_37 = arith.constant 0 : index
    %51 = vector.load %arg4[%c0_34, %c2_35, %c0_36, %c0_37] : memref<1x4x8x16xf32, #tpu.memory_space<vmem>>, vector<1x1x8x16xf32>
    %52 = vector.shape_cast %51 : vector<1x1x8x16xf32> to vector<8x16xf32>
    %53 = arith.subf %52, %17 : vector<8x16xf32>
    %54 = math.exp %53 : vector<8x16xf32>
    %55 = arith.addf %40, %54 : vector<8x16xf32>
    %c2_i32 = arith.constant 2 : i32
    %56 = vector.broadcast %c2_i32 : i32 to vector<8x16xi32>
    %57 = arith.cmpi eq, %6, %56 : vector<8x16xi32>
    %cst_38 = arith.constant 0.000000e+00 : f32
    %58 = vector.broadcast %cst_38 : f32 to vector<8x16xf32>
    %59 = arith.select %57, %52, %58 : vector<8x16xi1>, vector<8x16xf32>
    %60 = arith.addf %45, %59 : vector<8x16xf32>
    %c2_39 = arith.constant 2 : index
    %61 = memref.load %arg6[%c2_39] : memref<4xf32, #tpu.memory_space<smem>>
    %cst_40 = arith.constant 0.000000e+00 : f32
    %62 = vector.broadcast %61 : f32 to vector<8x16xf32>
    %63 = vector.broadcast %cst_40 : f32 to vector<8x16xf32>
    %64 = arith.select %57, %62, %63 : vector<8x16xi1>, vector<8x16xf32>
    %65 = arith.addf %50, %64 : vector<8x16xf32>
    %c0_41 = arith.constant 0 : index
    %c3_42 = arith.constant 3 : index
    %c0_43 = arith.constant 0 : index
    %c0_44 = arith.constant 0 : index
    %66 = vector.load %arg4[%c0_41, %c3_42, %c0_43, %c0_44] : memref<1x4x8x16xf32, #tpu.memory_space<vmem>>, vector<1x1x8x16xf32>
    %67 = vector.shape_cast %66 : vector<1x1x8x16xf32> to vector<8x16xf32>
    %68 = arith.subf %67, %17 : vector<8x16xf32>
    %69 = math.exp %68 : vector<8x16xf32>
    %70 = arith.addf %55, %69 : vector<8x16xf32>
    %c3_i32 = arith.constant 3 : i32
    %71 = vector.broadcast %c3_i32 : i32 to vector<8x16xi32>
    %72 = arith.cmpi eq, %6, %71 : vector<8x16xi32>
    %cst_45 = arith.constant 0.000000e+00 : f32
    %73 = vector.broadcast %cst_45 : f32 to vector<8x16xf32>
    %74 = arith.select %72, %67, %73 : vector<8x16xi1>, vector<8x16xf32>
    %75 = arith.addf %60, %74 : vector<8x16xf32>
    %c3_46 = arith.constant 3 : index
    %76 = memref.load %arg6[%c3_46] : memref<4xf32, #tpu.memory_space<smem>>
    %cst_47 = arith.constant 0.000000e+00 : f32
    %77 = vector.broadcast %76 : f32 to vector<8x16xf32>
    %78 = vector.broadcast %cst_47 : f32 to vector<8x16xf32>
    %79 = arith.select %72, %77, %78 : vector<8x16xi1>, vector<8x16xf32>
    %80 = arith.addf %65, %79 : vector<8x16xf32>
    %81 = math.log %70 : vector<8x16xf32>
    %82 = arith.addf %81, %17 : vector<8x16xf32>
    %c2_i32_48 = arith.constant 2 : i32
    %83 = vector.broadcast %c2_i32_48 : i32 to vector<8x16xi32>
    %84 = arith.cmpi ne, %6, %83 : vector<8x16xi32>
    %c0_49 = arith.constant 0 : index
    %c0_50 = arith.constant 0 : index
    %c0_51 = arith.constant 0 : index
    %85 = vector.load %arg8[%c0_49, %c0_50, %c0_51] : memref<2x8x16xf32, #tpu.memory_space<vmem>>, vector<1x8x16xf32>
    %86 = vector.shape_cast %85 : vector<1x8x16xf32> to vector<8x16xf32>
    %87 = arith.subf %82, %75 : vector<8x16xf32>
    %88 = arith.mulf %80, %87 : vector<8x16xf32>
    %cst_52 = arith.constant 0.000000e+00 : f32
    %89 = vector.broadcast %cst_52 : f32 to vector<8x16xf32>
    %90 = arith.select %84, %88, %89 : vector<8x16xi1>, vector<8x16xf32>
    %91 = arith.addf %86, %90 : vector<8x16xf32>
    %c0_53 = arith.constant 0 : index
    %c0_54 = arith.constant 0 : index
    %c0_55 = arith.constant 0 : index
    %92 = vector.load %arg8[%c0_53, %c0_54, %c0_55] : memref<2x8x16xf32, #tpu.memory_space<vmem>>, vector<1x8x16xf32>
    %93 = vector.shape_cast %92 : vector<1x8x16xf32> to vector<8x16xf32>
    %94 = vector.shape_cast %91 : vector<8x16xf32> to vector<1x8x16xf32>
    tpu.vector_store %arg8[%c0_53, %c0_54, %c0_55], %94 {strides = array<i32>} : memref<2x8x16xf32, #tpu.memory_space<vmem>>, vector<1x8x16xf32>,
    %c1_56 = arith.constant 1 : index
    %c0_57 = arith.constant 0 : index
    %c0_58 = arith.constant 0 : index
    %95 = vector.load %arg8[%c1_56, %c0_57, %c0_58] : memref<2x8x16xf32, #tpu.memory_space<vmem>>, vector<1x8x16xf32>
    %96 = vector.shape_cast %95 : vector<1x8x16xf32> to vector<8x16xf32>
    %cst_59 = arith.constant 0.000000e+00 : f32
    %97 = vector.broadcast %cst_59 : f32 to vector<8x16xf32>
    %98 = arith.select %84, %80, %97 : vector<8x16xi1>, vector<8x16xf32>
    %99 = arith.addf %96, %98 : vector<8x16xf32>
    %c1_60 = arith.constant 1 : index
    %c0_61 = arith.constant 0 : index
    %c0_62 = arith.constant 0 : index
    %100 = vector.load %arg8[%c1_60, %c0_61, %c0_62] : memref<2x8x16xf32, #tpu.memory_space<vmem>>, vector<1x8x16xf32>
    %101 = vector.shape_cast %100 : vector<1x8x16xf32> to vector<8x16xf32>
    %102 = vector.shape_cast %99 : vector<8x16xf32> to vector<1x8x16xf32>
    tpu.vector_store %arg8[%c1_60, %c0_61, %c0_62], %102 {strides = array<i32>} : memref<2x8x16xf32, #tpu.memory_space<vmem>>, vector<1x8x16xf32>,
    %c0_i32_63 = arith.constant 0 : i32
    %103 = arith.cmpi eq, %arg2, %c0_i32_63 : i32
    %c0_i32_64 = arith.constant 0 : i32
    %104 = arith.cmpi eq, %arg3, %c0_i32_64 : i32
    %105 = arith.andi %103, %104 : i1
    %106 = arith.extui %105 : i1 to i32
    %c0_i32_65 = arith.constant 0 : i32
    %107 = arith.cmpi ne, %106, %c0_i32_65 : i32
    scf.if %107 {
      %c0_66 = arith.constant 0 : index
      %c0_67 = arith.constant 0 : index
      %c0_68 = arith.constant 0 : index
      %108 = vector.load %arg8[%c0_66, %c0_67, %c0_68] : memref<2x8x16xf32, #tpu.memory_space<vmem>>, vector<1x8x16xf32>
      %109 = vector.shape_cast %108 : vector<1x8x16xf32> to vector<8x16xf32>
      %cst_69 = arith.constant dense<0.000000e+00> : vector<16xf32>
      %110 = vector.multi_reduction <add>, %109, %cst_69 [0] : vector<8x16xf32> to vector<16xf32>
      %111 = vector.shape_cast %110 : vector<16xf32> to vector<1x16xf32>
      %c0_70 = arith.constant 0 : index
      %c0_71 = arith.constant 0 : index
      %c0_72 = arith.constant 0 : index
      %c0_73 = arith.constant 0 : index
      %c0_74 = arith.constant 0 : index
      %112 = vector.load %arg7[%c0_70, %c0_71, %c0_72, %c0_73, %c0_74] : memref<1x1x2x1x16xf32, #tpu.memory_space<vmem>>, vector<1x1x1x1x16xf32>
      %113 = vector.shape_cast %112 : vector<1x1x1x1x16xf32> to vector<1x16xf32>
      %114 = vector.shape_cast %111 : vector<1x16xf32> to vector<1x1x1x1x16xf32>
      tpu.vector_store %arg7[%c0_70, %c0_71, %c0_72, %c0_73, %c0_74], %114 {strides = array<i32>} : memref<1x1x2x1x16xf32, #tpu.memory_space<vmem>>, vector<1x1x1x1x16xf32>,
      %c1_75 = arith.constant 1 : index
      %c0_76 = arith.constant 0 : index
      %c0_77 = arith.constant 0 : index
      %115 = vector.load %arg8[%c1_75, %c0_76, %c0_77] : memref<2x8x16xf32, #tpu.memory_space<vmem>>, vector<1x8x16xf32>
      %116 = vector.shape_cast %115 : vector<1x8x16xf32> to vector<8x16xf32>
      %cst_78 = arith.constant dense<0.000000e+00> : vector<16xf32>
      %117 = vector.multi_reduction <add>, %116, %cst_78 [0] : vector<8x16xf32> to vector<16xf32>
      %118 = vector.shape_cast %117 : vector<16xf32> to vector<1x16xf32>
      %c0_79 = arith.constant 0 : index
      %c0_80 = arith.constant 0 : index
      %c1_81 = arith.constant 1 : index
      %c0_82 = arith.constant 0 : index
      %c0_83 = arith.constant 0 : index
      %119 = vector.load %arg7[%c0_79, %c0_80, %c1_81, %c0_82, %c0_83] : memref<1x1x2x1x16xf32, #tpu.memory_space<vmem>>, vector<1x1x1x1x16xf32>
      %120 = vector.shape_cast %119 : vector<1x1x1x1x16xf32> to vector<1x16xf32>
      %121 = vector.shape_cast %118 : vector<1x16xf32> to vector<1x1x1x1x16xf32>
      tpu.vector_store %arg7[%c0_79, %c0_80, %c1_81, %c0_82, %c0_83], %121 {strides = array<i32>} : memref<1x1x2x1x16xf32, #tpu.memory_space<vmem>>, vector<1x1x1x1x16xf32>,
    } else {
    }
    return
  }
  func.func @transform_0(%arg0: i32, %arg1: i32, %arg2: i32, %arg3: i32) -> (i32, i32, i32, i32) {
    %c1_i32 = arith.constant 1 : i32
    %0 = arith.muli %arg1, %c1_i32 : i32
    %1 = arith.addi %0, %arg2 : i32
    %c0_i32 = arith.constant 0 : i32
    %c0_i32_0 = arith.constant 0 : i32
    return %arg0, %c0_i32, %1, %arg3 : i32, i32, i32, i32
  }
  func.func @transform_1(%arg0: i32, %arg1: i32, %arg2: i32, %arg3: i32) -> (i32, i32, i32) {
    %c1_i32 = arith.constant 1 : i32
    %0 = arith.muli %arg1, %c1_i32 : i32
    %1 = arith.addi %0, %arg2 : i32
    %c0_i32 = arith.constant 0 : i32
    return %arg0, %1, %arg3 : i32, i32, i32
  }
  func.func @transform_2(%arg0: i32, %arg1: i32, %arg2: i32, %arg3: i32) -> i32 {
    %c0_i32 = arith.constant 0 : i32
    %c0_i32_0 = arith.constant 0 : i32
    return %c0_i32 : i32
  }
  func.func @transform_3(%arg0: i32, %arg1: i32, %arg2: i32, %arg3: i32) -> (i32, i32, i32, i32, i32) {
    %c0_i32 = arith.constant 0 : i32
    %c0_i32_0 = arith.constant 0 : i32
    %c0_i32_1 = arith.constant 0 : i32
    %c0_i32_2 = arith.constant 0 : i32
    return %arg0, %arg1, %c0_i32, %c0_i32_0, %c0_i32_1 : i32, i32, i32, i32, i32
  }
}

</mosaic_0001>

<bundles_post_ra>
// kernel: tpu_custom_call.1
= control target key start
LH: loop header
LB: loop body
LE: loop exit
PB: predicated region body
PF: predicated region fallthrough
CT: control target
= control target key end

     0   :  { %s1181_s0 = inlined_call_operand.hbm [shape: f32[2,4,16,16], index: 0, kind: input, shape index: {}]   ;;  %s1182_s1 = inlined_call_operand.hbm [shape: s32[2,16,16], index: 1, kind: input, shape index: {}]   ;;  %s1183_s2 = inlined_call_operand.vmem [shape: f32[4], index: 2, kind: input, shape index: {}]   ;;  %s1184_s3 = inlined_call_operand.hbm [shape: f32[2,2,2,1,16], index: 3, kind: output, shape index: {}]  }
   0x1   :  { %1193 = sst [smem:[#allocation21_spill]] %s1181_s0 }
   0x2   :  { %1194 = sst [smem:[#allocation22_spill]] %s1183_s2 }
   0x3   :  { %8 = vsyncpa [#allocation4], 0 }
   0x4   :  { %10 = vsyncpa [#allocation4 + $0x1], 0 }
   0x5   :  { %11 = vsyncpa [#allocation8], 0 }
   0x6   :  { %13 = vsyncpa [#allocation8 + $0x1], 0 }
   0x7   :  { %14 = vsyncpa [#allocation6], 0 }
   0x8   :  { %15 = vsyncpa [#allocation5], 0 }
   0x9   :  { %17 = vsyncpa [#allocation5 + $0x1], 0  ;;  %s895_s12 = smov 0   ;;  %s897_s13 = smov 0  }
   0xa   :  { %s899_s14 = smov 0   ;;  %s901_s15 = smov 0  }
   0xb   :  { %s903_s16 = smov 0   ;;  %s905_s17 = smov 0  }
   0xc   :  { %s907_s18 = smov 0   ;;  %s909_s19 = smov 0  }
   0xd LB: > { %1195 = sst [smem:[#allocation15_spill]] %s835_s12  ;;  %s543_s20 = sadd.s32 4294967295, %s863_s19   ;;  %s863_s19 = sphi %s909_s19, %s23_s19   ;;  %s859_s18 = sphi %s907_s18, %s1225_s18   ;;  %s855_s17 = sphi %s905_s17, %s1224_s17   ;;  %s851_s16 = sphi %s903_s16, %s1223_s16   ;;  %s847_s15 = sphi %s901_s15, %s1222_s15   ;;  %s843_s14 = sphi %s899_s14, %s1217_s14   ;;  %s839_s13 = sphi %s897_s13, %s1221_s13   ;;  %s835_s12 = sphi %s895_s12, %s1220_s12  }
   0xe   : > { %1196 = sst [smem:[#allocation16_spill]] %s843_s14  ;;  %s544_s21 = sadd.s32 4294967294, %s863_s19  }
   0xf   : > { %p69_p0 = scmp.ne.s32.totalorder %s843_s14, %s839_s13  ;;  %p70_p1 = scmp.eq.s32.totalorder %s863_s19, 0 }
  0x10   : > { %p75_p2 = scmp.ne.s32.totalorder %s839_s13, %s835_s12  ;;  %p943_p3 = scmp.eq.s32.totalorder %s543_s20, 0 }
  0x11   : > { %p154_p4 = scmp.eq.s32.totalorder %s543_s20, 3  ;;  %p71_p5 = por %p70_p1, %p69_p0 }
  0x12   : > { %p160_p6 = scmp.eq.s32.totalorder %s544_s21, 3  ;;  %p949_p7 = por %p943_p3, %p75_p2 }
  0x13   : > { %p953_p8 = por %p154_p4, %p69_p0  ;;  %p545_p10 = scmp.ge.s32.totalorder %s863_s19, 1 }
  0x14   : > { %s1198_s24 = scalar_select %p949_p7, 1, 0 }
  0x15   : > { %s1199_s25 = scalar_select %p953_p8, 1, 0 }
  0x16   : > { %p957_p9 = por %p160_p6, %p75_p2  ;;  %p167_p11 = scmp.lt.s32.totalorder %s863_s19, 5 }
  0x17   : > { %s1202_s2 = sld [smem:[#allocation22_spill]]  ;;  %p598_p13 = scmp.lt.s32.totalorder %s863_s19, 4 }
  0x18   : > { %s1200_s26 = scalar_select %p957_p9, 1, 0 }
  0x19   : > { %p966_p12 = pnand %p545_p10, %p167_p11  ;;  %p973_p1 = pnand %p598_p13, %p71_p5 }
  0x1a   : > { %1201 = sst [smem:[#allocation17_spill]] %s1200_s26  ;;  %s45_s5 = sadd.s32 1, %s855_s17 }
  0x1b   : > { %s1203_s30 = scalar_select %p966_p12, 1, 0 }
  0x1c   : > { %p582_p0 = pneg %p966_p12 }
  0x1d   : > { %s180_s29 = sshll.u32 %s1202_s2, 4  ;;  %s181_s29 = int_to_ptr.vmem [resolvable:$true] %s180_s29 }
  0x1e   : > { %p583_p2 = pnand %p582_p0, %p943_p3  ;;  %s682_s6 = scalar_lea.vmem %s181_s29, 16 }
  0x1f   : > { %p683_p4 = scmp.ne.s32.totalorder %s181_s29, %s682_s6  ;;  %p690_p11 = scmp.lt.s32.totalorder %s181_s29, %s181_s29 }
  0x20   : > { %p684_p6 = pneg %p583_p2  ;;  %p691_p8 = scmp.lt.s32.totalorder %s682_s6, %s682_s6 }
  0x22   : > { %p685_p9 = pnand %p684_p6, %p683_p4  ;;  %p692_p7 = por %p691_p8, %p690_p11 }
  0x24   : > { %p686_p10 = pneg %p685_p9 }
  0x26   : > { %p693_p12 = pnand %p692_p7, %p686_p10 }
  0x28   : > { %696 = shalt.err (!%p693_p12)
}
  0x29   : > { %s865_s7 = smov [#allocation9]   ;;  %p47_p5 = scmp.ge.s32.totalorder %s45_s5, 2 }
  0x2a   : > { %585 = dma.vmem_to_smem (!%p583_p2), %s181_s29, 16, %s865_s7, [#allocation6]  }
  0x2b   : > { %s49_s8 = sadd.s32 1, %s859_s18  ;;  %s982_s9 = sand.u32 1, %s843_s14  }
  0x2c   : > { %s549_s10 = sshll.u32 %s859_s18, 3  ;;  %s1227_s5 = smov (%p47_p5, %s45_s5), 0 }
  0x2d   : > { %1205 = sst [smem:[#allocation18_spill]] %s1227_s5  ;;  %s1229_s8 = smov (!%p47_p5, %s49_s8), %s859_s18 }
  0x2e   : > { %s56_s11 = ssub.s32 %s855_s17, %s1227_s5  ;;  %p51_p7 = scmp.ge.s32.totalorder %s1229_s8, 2 }
  0x2f   : > { %s548_s20 = sshll.u32 %s982_s9, 5  ;;  %s202_s21 = sadd.s32 %s855_s17, %s549_s10 }
  0x30   : > { %s1231_s8 = smov (%p51_p7, %s1229_s8), 0  ;;  %s550_s27 = sshll.u32 %s202_s21, 7 }
  0x31   : > { %1206 = sst [smem:[#allocation19_spill]] %s1231_s8  ;;  %s195_s28 = scalar_lea.vmem [#allocation3], %s548_s20 }
  0x32   : > { %s205_s29 = sshll.u32 %s195_s28, 4  ;;  %s55_s6 = ssub.s32 %s859_s18, %s1231_s8  ;;  %s1001_s29 = int_to_ptr.vmem [resolvable:$true] %s205_s29 }
  0x33   : > { %s1207_s0 = sld [smem:[#allocation21_spill]]  ;;  %s57_s5 = sor.u32 %s56_s11, %s55_s6 }
  0x34   : > { %p60_p8 = scmp.eq.s32.totalorder %s57_s5, 0  ;;  %s1208_s10 = sadd.s32 1, %s843_s14 }
  0x35   : > { %s192_s21 = scalar_lea.sflag [#allocation4], %s982_s9  ;;  %p699_p12 = pneg %p973_p1 }
  0x36   : > { %s1006_s26 = scalar_select %p60_p8, %s843_s14, %s1208_s10  }
  0x38   : > { %1209 = sst [smem:[#allocation20_spill]] %s1006_s26 }
  0x39   : > { %s999_s2 = scalar_lea.hbm %s1207_s0, %s550_s27  ;;  %s702_s28 = scalar_lea.hbm %s1207_s0, 2048 }
  0x3a   : > { %s697_s20 = scalar_lea.hbm %s999_s2, 512  ;;  %p703_p2 = scmp.lt.u32.totalorder %s999_s2, %s1207_s0 }
  0x3b   : > { %p698_p9 = scmp.ne.s32.totalorder %s999_s2, %s697_s20  ;;  %p704_p4 = scmp.lt.u32.totalorder %s702_s28, %s697_s20 }
  0x3c   : > { %p706_p10 = scmp.lt.u32.totalorder %s697_s20, %s999_s2 }
  0x3d   : > { %p700_p13 = pnand %p699_p12, %p698_p9  ;;  %p705_p6 = por %p704_p4, %p703_p2 }
  0x3f   : > { %p701_p0 = pneg %p700_p13  ;;  %p707_p11 = por %p706_p10, %p705_p6 }
  0x41   : > { %p708_p5 = pnand %p707_p11, %p701_p0 }
  0x43   : > { %711 = shalt.err (!%p708_p5)
}
  0x44   : > { %s712_s5 = scalar_lea.vmem %s1001_s29, 512  ;;  %s866_s7 = smov [#allocation3]  }
  0x45   : > { %p713_p7 = scmp.ne.s32.totalorder %s1001_s29, %s712_s5  ;;  %s717_s10 = sshll.u32 %s866_s7, 4  ;;  %s718_s10 = int_to_ptr.vmem [resolvable:$false] %s717_s10 }
  0x46   : > { %s719_s22 = scalar_lea.vmem %s718_s10, 1024  ;;  %p720_p13 = scmp.lt.s32.totalorder %s1001_s29, %s718_s10 }
  0x47   : > { %p715_p8 = pnand %p713_p7, %p699_p12  ;;  %p721_p2 = scmp.lt.s32.totalorder %s719_s22, %s712_s5 }
  0x49   : > { %p716_p9 = pneg %p715_p8  ;;  %p722_p4 = por %p721_p2, %p720_p13 }
  0x4b   : > { %p723_p6 = pnand %p722_p4, %p716_p9 }
  0x4d   : > { %726 = shalt.err (!%p723_p6)
}
  0x4e   : > { %s867_s20 = smov 256   ;;  %s868_s27 = smov 128  }
  0x4f   : > { %s869_s28 = smov 8   ;;  %s551_s11 = sshll.u32 %s982_s9, 3 }
  0x50   : > { %589 = dma.hbm_to_vmem [thread:$0]  (!%p973_p1), %s999_s2, 512, %s1001_s29, %s192_s21, %s867_s20, %s868_s27, %s869_s28  }
  0x51   : > { %s552_s6 = sshll.u32 %s859_s18, 1  ;;  %s219_s7 = scalar_lea.vmem [#allocation7], %s551_s11 }
  0x52   : > { %s226_s5 = sadd.s32 %s855_s17, %s552_s6  ;;  %s230_s10 = sshll.u32 %s219_s7, 4  ;;  %s1039_s10 = int_to_ptr.vmem [resolvable:$true] %s230_s10 }
  0x53   : > { %s553_s22 = sshll.u32 %s226_s5, 7  ;;  %s216_s14 = scalar_lea.sflag [#allocation8], %s982_s9 }
  0x54   : > { %s228_s26 = scalar_lea.hbm %s1182_s1, %s553_s22  ;;  %s732_s21 = scalar_lea.hbm %s1182_s1, 512 }
  0x55   : > { %s727_s12 = scalar_lea.hbm %s228_s26, 128  ;;  %p733_p5 = scmp.lt.u32.totalorder %s228_s26, %s1182_s1 }
  0x56   : > { %p728_p0 = scmp.ne.s32.totalorder %s228_s26, %s727_s12  ;;  %p734_p7 = scmp.lt.u32.totalorder %s732_s21, %s727_s12 }
  0x57   : > { %p736_p9 = scmp.lt.u32.totalorder %s727_s12, %s228_s26 }
  0x58   : > { %p730_p10 = pnand %p728_p0, %p699_p12  ;;  %p735_p8 = por %p734_p7, %p733_p5 }
  0x5a   : > { %p731_p11 = pneg %p730_p10  ;;  %p737_p13 = por %p736_p9, %p735_p8 }
  0x5c   : > { %p738_p2 = pnand %p737_p13, %p731_p11 }
  0x5e   : > { %741 = shalt.err (!%p738_p2)
}
  0x5f   : > { %s742_s0 = scalar_lea.vmem %s1039_s10, 128  ;;  %s870_s8 = smov [#allocation7]  }
  0x60   : > { %p743_p4 = scmp.ne.s32.totalorder %s1039_s10, %s742_s0  ;;  %s747_s9 = sshll.u32 %s870_s8, 4  ;;  %s748_s9 = int_to_ptr.vmem [resolvable:$false] %s747_s9 }
  0x61   : > { %s749_s28 = scalar_lea.vmem %s748_s9, 256  ;;  %p750_p10 = scmp.lt.s32.totalorder %s1039_s10, %s748_s9 }
  0x62   : > { %p745_p6 = pnand %p743_p4, %p699_p12  ;;  %p751_p5 = scmp.lt.s32.totalorder %s749_s28, %s742_s0 }
  0x64   : > { %p746_p0 = pneg %p745_p6  ;;  %p752_p7 = por %p751_p5, %p750_p10 }
  0x66   : > { %p753_p8 = pnand %p752_p7, %p746_p0 }
  0x68   : > { %756 = shalt.err (!%p753_p8)
}
  0x69   : > { %592 = dma.hbm_to_vmem [thread:$0]  (!%p973_p1), %s228_s26, 128, %s1039_s10, %s216_s14  }
  0x6a   : > { %p1210_p11 = scmp.ne.s32.totalorder %s1203_s30, 0 }
  0x6b   : > { %s1066_s12 = sand.u32 (!%p1210_p11), 1, %s839_s13   ;;  %p1211_p12 = scmp.ne.s32.totalorder (!%p1210_p11), %s1198_s24, 0 }
  0x6c   : > { %239 = sbr.rel (%p1210_p11) target bundleno = 210 (0xd2), region = 32  ;;  %s555_s11 = sshll.u32 (!%p1210_p11), %s1066_s12, 5 }
  0x6d   : > { %s242_s6 = scalar_lea.sflag (!%p1210_p11), [#allocation4], %s1066_s12  ;;  %s245_s5 = scalar_lea.vmem (!%p1210_p11), [#allocation3], %s555_s11 }
  0x73   : > { %818 = dma.done.wait (%p1211_p12), %s242_s6, 512  }
  0x74   : > { %820 = vsyncadd (%p1211_p12), %s242_s6, 4294966784  ;;  %s556_s14 = sshll.u32 %s1066_s12, 3  ;;  %s251_s26 = scalar_lea.sflag [#allocation8], %s1066_s12 }
  0x75   : > { %s254_s30 = scalar_lea.vmem [#allocation7], %s556_s14 }
  0x76   : > { %822 = dma.done.wait (%p1211_p12), %s251_s26, 128  }
  0x77   : > { %824 = vsyncadd (%p1211_p12), %s251_s26, 4294967168 }
  0x78   : > { %826 = dma.done.wait (%p943_p3), [#allocation6], 16  }
  0x79   : > { %828 = vsyncadd (%p943_p3), [#allocation6], 4294967280 }
  0x7a   : > { %263 = sfence }
  0x7b   : > { %vm295_vm0 = vcmask 130048   ;;  %v299_v0 = vld [vmem:[%s245_s5] sm:$0xff]  ;;  %v559_v1 = vld [vmem:[%s245_s5 + $0x8] sm:$0xff]  ;;  %v871_v2 = vmov 0.0   ;;  %v560_v4 = vld [vmem:[%s245_s5 + $0x10] sm:$0xff]  ;;  %s316_s4 = sld [smem:[#allocation9]] }
  0x7c   : > { %297 = vst.msk [vmem:[#allocation2 + $0x8] sm:$0xff] %vm295_vm0, %v871_v2  ;;  %296 = vst.msk [vmem:[#allocation2] sm:$0xff] %vm295_vm0, %v871_v2  ;;  %v302_v3 = vmax.f32 %v299_v0, %v559_v1  ;;  %v1086_v5 = vld [vmem:[%s254_s30] sm:$0xff]  ;;  %v561_v6 = vld [vmem:[%s245_s5 + $0x18] sm:$0xff]  ;;  %s562_s24 = sld [smem:[#allocation9 + $0x1]]  ;;  %s563_s7 = sld [smem:[#allocation9 + $0x2]] }
  0x7d   : > { %s564_s23 = sld [smem:[#allocation9 + $0x3]]  ;;  %vm313_vm1 = vcmp.eq.s32.totalorder %v1086_v5, 0  ;;  %vm324_vm2 = vcmp.eq.s32.totalorder %v1086_v5, 1  ;;  %vm335_vm3 = vcmp.eq.s32.totalorder %v1086_v5, 2  ;;  %vm346_vm4 = vcmp.eq.s32.totalorder %v1086_v5, 3  ;;  %s558_s10 = sshll.u32 %s1066_s12, 1 }
  0x7e   : > { %v305_v7 = vmax.f32 %v302_v3, %v560_v4  ;;  %vm356_vm5 = vcmp.ne.s32.totalorder %v1086_v5, 2  ;;  %v314_v41 = vsel %vm313_vm1, %v299_v0, 0.0  ;;  %v325_v42 = vsel %vm324_vm2, %v559_v1, 0.0  ;;  %s286_s22 = scalar_lea.vmem [#allocation10], %s558_s10  ;;  %s567_s2 = sshll.u32 %s847_s15, 1 }
  0x7f   : > { %v326_v44 = vadd.f32 %v325_v42, %v314_v41  ;;  %v336_v46 = vsel %vm335_vm3, %v560_v4, 0.0  ;;  %v347_v50 = vsel %vm346_vm4, %v561_v6, 0.0  ;;  %vm379_vm6 = vcmask 122880   ;;  %s568_s29 = sshll.u32 %s851_s16, 2  ;;  %s407_s20 = sshll.u32 %s286_s22, 4  ;;  %s1121_s20 = int_to_ptr.vmem [resolvable:$true] %s407_s20 }
  0x80   : > { %v308_v8 = vmax.f32 %v305_v7, %v561_v6  ;;  %s404_s21 = sadd.s32 %s568_s29, %s567_s2  ;;  %s392_s15 = scalar_lea.sflag [#allocation5], %s1066_s12 }
  0x81   : > { %v317_v10 = vstv %s316_s4  ;;  %v337_v48 = vadd.f32 %v336_v46, %v326_v44  ;;  %s569_s27 = sshll.u32 %s404_s21, 4  ;;  %s757_s16 = scalar_lea.vmem %s1121_s20, 32 }
  0x82   : > { %v309_v9 = vsub.f32 %v299_v0, %v308_v8  ;;  %v320_v11 = vsub.f32 %v559_v1, %v308_v8  ;;  %v331_v12 = vsub.f32 %v560_v4, %v308_v8  ;;  %v318_v13 = vsel %vm313_vm1, %v317_v10, 0.0  ;;  %s1126_s9 = scalar_lea.hbm %s1184_s3, %s569_s27  ;;  %p758_p3 = scmp.ne.s32.totalorder %s1121_s20, %s757_s16 }
  0x83   : > { %v328_v14 = vstv %s562_s24  ;;  %v342_v15 = vsub.f32 %v561_v6, %v308_v8  ;;  %v339_v19 = vstv %s563_s7  ;;  %v350_v24 = vstv %s564_s23  ;;  %v365_v28 = vld [vmem:[#allocation2 + $0x8] sm:$0xff]  ;;  %v357_v57 = vld [vmem:[#allocation2] sm:$0xff]  ;;  %p1212_p1 = scmp.ne.s32.totalorder %s1199_s25, 0  ;;  %s872_s28 = smov [#allocation10]  }
  0x84   : > { %v310_v16 = vmul.f32 1.442695, %v309_v9  ;;  %v321_v17 = vmul.f32 1.442695, %v320_v11  ;;  %v329_v18 = vsel %vm324_vm2, %v328_v14, 0.0  ;;  %v340_v22 = vsel %vm335_vm3, %v339_v19, 0.0 }
  0x85   : > { %v330_v20 = vadd.f32 %v329_v18, %v318_v13  ;;  %v332_v21 = vmul.f32 1.442695, %v331_v12  ;;  %v343_v23 = vmul.f32 1.442695, %v342_v15  ;;  %v351_v26 = vsel %vm346_vm4, %v350_v24, 0.0  ;;  %p759_p9 = pnand %p758_p3, %p1212_p1  ;;  %s761_s11 = sshll.u32 %s872_s28, 4  ;;  %s762_s11 = int_to_ptr.vmem [resolvable:$false] %s761_s11 }
  0x86   : > { %672 = vpow2.f32 %v310_v16  ;;  %v348_v53 = vadd.f32 %v347_v50, %v337_v48  ;;  %s763_s6 = scalar_lea.vmem %s762_s11, 64  ;;  %p764_p2 = scmp.lt.s32.totalorder %s1121_s20, %s762_s11 }
  0x87   : > { %674 = vpow2.f32 %v321_v17  ;;  %v341_v25 = vadd.f32 %v340_v22, %v330_v20  ;;  %p760_p13 = pneg %p759_p9  ;;  %p765_p4 = scmp.lt.s32.totalorder %s763_s6, %s757_s16 }
  0x88   : > { %676 = vpow2.f32 %v332_v21 }
  0x89   : > { %678 = vpow2.f32 %v343_v23  ;;  %v352_v27 = vadd.f32 %v351_v26, %v341_v25  ;;  %p766_p6 = por %p765_p4, %p764_p2 }
  0x8b   : > { %v366_v29 = vsel %vm356_vm5, %v352_v27, 0.0  ;;  %p767_p0 = pnand %p766_p6, %p760_p13 }
  0x8c   : > { %v367_v30 = vadd.f32 %v366_v29, %v365_v28 }
  0x8e   : > { %368 = vst.msk [vmem:[#allocation2 + $0x8] sm:$0xff] %vm295_vm0, %v367_v30 }
  0x90   : > { %v673_v31 = vpop.eup %672 }
  0x91   : > { %v675_v32 = vpop.eup %674 }
  0x92   : > { %v677_v33 = vpop.eup %676  ;;  %v323_v34 = vadd.f32 %v675_v32, %v673_v31 }
  0x93   : > { %v679_v35 = vpop.eup %678 }
  0x94   : > { %v334_v36 = vadd.f32 %v677_v33, %v323_v34 }
  0x95   : > { %v381_v37 = vld [vmem:[#allocation2 + $0x8] sm:$0xff] }
  0x96   : > { %v345_v38 = vadd.f32 %v679_v35, %v334_v36  ;;  %v382_v39 = vsel %vm295_vm0, %v381_v37, 0.0 }
  0x97   : > { %v383_v40 = vrot.slane %v382_v39, 4 }
  0x98   : > { %680 = vlog2.f32 %v345_v38 }
  0x99   : > { %v384_v43 = vadd.f32 %v383_v40, %v382_v39 }
  0x9b   : > { %v385_v45 = vrot.slane %v384_v43, 2 }
  0x9d   : > { %v386_v47 = vadd.f32 %v385_v45, %v384_v43 }
  0x9f   : > { %v387_v49 = vrot.slane %v386_v47, 1 }
  0xa1   : > { %v388_v51 = vadd.f32 %v387_v49, %v386_v47 }
  0xa2   : > { %v681_v52 = vpop.eup %680 }
  0xa3   : > { %v354_v54 = vmul.f32 0.6931472, %v681_v52  ;;  %565 = vst.msk [vmem:[%s286_s22 + $0x1] sm:$0x1] %vm379_vm6, %v388_v51 }
  0xa5   : > { %v355_v55 = vadd.f32 %v354_v54, %v308_v8 }
  0xa7   : > { %v358_v56 = vsub.f32 %v355_v55, %v348_v53 }
  0xa9   : > { %v359_v58 = vmul.f32 %v358_v56, %v352_v27 }
  0xab   : > { %v360_v59 = vsel %vm356_vm5, %v359_v58, 0.0 }
  0xac   : > { %v361_v60 = vadd.f32 %v360_v59, %v357_v57 }
  0xae   : > { %363 = vst.msk [vmem:[#allocation2] sm:$0xff] %vm295_vm0, %v361_v60 }
  0xb5   : > { %v371_v61 = vld [vmem:[#allocation2] sm:$0xff] }
  0xb6   : > { %v372_v62 = vsel %vm295_vm0, %v371_v61, 0.0 }
  0xb7   : > { %v373_v63 = vrot.slane %v372_v62, 4 }
  0xb9   : > { %v374_v0 = vadd.f32 %v373_v63, %v372_v62 }
  0xbb   : > { %v375_v1 = vrot.slane %v374_v0, 2 }
  0xbd   : > { %v376_v2 = vadd.f32 %v375_v1, %v374_v0 }
  0xbf   : > { %v377_v3 = vrot.slane %v376_v2, 1 }
  0xc1   : > { %v378_v4 = vadd.f32 %v377_v3, %v376_v2 }
  0xc3   : > { %380 = vst.msk [vmem:[%s286_s22] sm:$0x1] %vm379_vm6, %v378_v4 }
  0xc4   : > { %770 = shalt.err (!%p767_p0)
}
  0xc5   : > { %s771_s5 = scalar_lea.hbm %s1126_s9, 32  ;;  %s775_s30 = scalar_lea.hbm %s1184_s3, 128 }
  0xc6   : > { %p772_p10 = scmp.ne.s32.totalorder %s1126_s9, %s771_s5  ;;  %p776_p8 = scmp.lt.u32.totalorder %s1126_s9, %s1184_s3 }
  0xc7   : > { %p777_p11 = scmp.lt.u32.totalorder %s775_s30, %s771_s5  ;;  %p779_p3 = scmp.lt.u32.totalorder %s771_s5, %s1126_s9 }
  0xc8   : > { %p773_p5 = pnand %p772_p10, %p1212_p1 }
  0xc9   : > { %p778_p12 = por %p777_p11, %p776_p8 }
  0xca   : > { %p774_p7 = pneg %p773_p5 }
  0xcb   : > { %p780_p9 = por %p779_p3, %p778_p12 }
  0xcd   : > { %p781_p13 = pnand %p780_p9, %p774_p7 }
  0xcf   : > { %784 = shalt.err (!%p781_p13)
}
  0xd0   : > { %s873_s7 = smov 16   ;;  %s874_s23 = smov 1  }
  0xd1   : > { %580 = dma.vmem_to_hbm [thread:$0]  (%p1212_p1), %s1121_s20, 32, %s1126_s9, %s392_s15, %s873_s7, %s873_s7, %s874_s23  }
  0xd2 PF: > { %s1213_s10 = sld [smem:[#allocation15_spill]]  ;;  %s1214_s22 = sld [smem:[#allocation17_spill]] }
  0xd3   : > { %p600_p2 = scmp.ge.s32.totalorder %s863_s19, 2 }
  0xd8   : > { %s422_s2 = sand.u32 1, %s1213_s10   ;;  %p1215_p4 = scmp.ne.s32.totalorder %s1214_s22, 0 }
  0xd9   : > { %s423_s29 = scalar_lea.sflag [#allocation5], %s422_s2 }
  0xda   : > { %p594_p6 = pnand %p600_p2, %p1215_p4 }
  0xdc   : > { %830 = dma.done.wait (!%p594_p6), %s423_s29, 32  }
  0xdd   : > { %832 = vsyncadd (!%p594_p6), %s423_s29, 4294967264  ;;  %s23_s19 = sadd.s32 1, %s863_s19   ;;  %s1216_s21 = sld [smem:[#allocation16_spill]] }
  0xde   : > { %p20_p0 = scmp.ge.s32.totalorder %s23_s19, 6   ;;  %s1217_s14 = sld [smem:[#allocation20_spill]] }
  0xdf   : > { %s1218_s25 = sld [smem:[#allocation18_spill]]  ;;  %s1219_s20 = sld [smem:[#allocation19_spill]] }
  0xe0   : > { %s1220_s12 = smov %s839_s13  ;;  %s1222_s15 = smov %s855_s17 }
  0xe1   : > { %s1223_s16 = smov %s859_s18  ;;  %22 = sbr.rel (!%p20_p0) target bundleno = 13 (0xd), region = 108 }
  0xe3   : > { %s1221_s13 = smov %s1216_s21 }
  0xe5   : > { %s1224_s17 = smov %s1218_s25  ;;  %s1225_s18 = smov %s1219_s20 }
  0xe8   :  { %428 = vsyncpa [#allocation4], 1 }
  0xe9   :  { %430 = vsyncpa [#allocation4 + $0x1], 1 }
  0xea   :  { %431 = vsyncpa [#allocation8], 1 }
  0xeb   :  { %433 = vsyncpa [#allocation8 + $0x1], 1 }
  0xec   :  { %434 = vsyncpa [#allocation5], 1 }
  0xed   :  { %436 = vsyncpa [#allocation5 + $0x1], 1 }
  0xee   :  { %437 = vsyncpa [#allocation6], 1 }
  0xef   :  { %439 = vsyncpa [#allocation6 + $0x1], 1 }

</bundles_post_ra>
